<compile_context>
chip_gen: v7x
topology: tpu7x:2x2x1
jax: 0.10.0
libtpu: 0.0.40
codegen_flags: <defaults>
</compile_context>

<pallas_src>
import jax
import jax.numpy as jnp
from jax.experimental import pallas as pl
from jax.experimental.pallas import tpu as pltpu

IN_FEATURES = 320
OUT_FEATURES = 50
OUT_PAD = 128  # lane-dense padded output width (one full vreg lane set / MXU column pass)


def _round_up(n, m):
    return ((n + m - 1) // m) * m


def fc1_relu_kernel(x_ref, w_ref, b_ref, o_ref):
    # x_ref: (Bt, 320) f32   w_ref: (320, 128) bf16   b_ref: (1, 128) f32   o_ref: (Bt, 128) bf16
    x = x_ref[...].astype(jnp.bfloat16)          # on-chip cast (VPU), keeps HBM read at f32-once
    y = jnp.dot(x, w_ref[...], preferred_element_type=jnp.float32)
    y = jnp.maximum(y + b_ref[...], 0.0)         # bias add + ReLU in f32 registers
    o_ref[...] = y.astype(o_ref.dtype)           # bf16 writeback; dropout == identity (eval mode)


def prepare_edge_params(w, b):
    """One-time parameter prep: pad fc1 weight/bias to the lane-dense width and cast.

    w: (320, 50) in (in, out) layout, b: (50,).
    Returns (w_p: (320, 128) bf16, b_p: (1, 128) f32). Padded bias columns are zero,
    so padded output columns are exactly ReLU(0) == 0 and any [:, :50] slice is exact.
    """
    n_pad = OUT_PAD - w.shape[1]
    w_p = jnp.pad(w, ((0, 0), (0, n_pad))).astype(jnp.bfloat16)
    b_p = jnp.pad(b, (0, n_pad)).reshape(1, OUT_PAD).astype(jnp.float32)
    return w_p, b_p


def _cost(rows, K):
    return pl.CostEstimate(
        flops=2 * rows * K * OUT_PAD,
        transcendentals=0,
        bytes_accessed=rows * K * 4            # f32 x read
        + K * OUT_PAD * 2                      # bf16 W read
        + OUT_PAD * 4                          # f32 bias read
        + rows * OUT_PAD * 2,                  # bf16 out write
    )


def lenet_edge_side_forward(x, w_p, b_p, *, batch_tile=2048, single_step_rows=1024,
                            pad_output=False):
    """x: (B, 320) f32, (w_p, b_p) from prepare_edge_params.

    Returns (B, 50) in x.dtype by default; with pad_output=True returns the
    lane-padded (B, 128) bf16 activation (padded columns are exactly zero) so a
    fused/padded fc2 can consume it without an extra slice+cast HBM pass.
    """
    B, K = x.shape

    if B <= single_step_rows:
        # Small-batch path: single grid step, full-array blocks resident in VMEM.
        out_p = pl.pallas_call(
            fc1_relu_kernel,
            out_shape=jax.ShapeDtypeStruct((B, OUT_PAD), jnp.bfloat16),
            in_specs=[
                pl.BlockSpec(memory_space=pltpu.VMEM),
                pl.BlockSpec(memory_space=pltpu.VMEM),
                pl.BlockSpec(memory_space=pltpu.VMEM),
            ],
            out_specs=pl.BlockSpec(memory_space=pltpu.VMEM),
            cost_estimate=_cost(B, K),
        )(x, w_p, b_p)
    else:
        # Gridded path: tile the batch axis, replicate W/bias, let the pipeline
        # double-buffer x/out tiles; "parallel" lets v7x shard the axis over 2 TCs.
        # Tile chosen so mid-size batches still get >= 2 grid steps; per-tile
        # double-buffered working set at bt=2048 is ~6 MiB (fits v7x 32 MiB scoped).
        bt = _round_up(min(batch_tile, _round_up(pl.cdiv(B, 2), 8)), 8)
        grid = (pl.cdiv(B, bt),)  # ragged last block handled by Pallas write-masking
        out_p = pl.pallas_call(
            fc1_relu_kernel,
            out_shape=jax.ShapeDtypeStruct((B, OUT_PAD), jnp.bfloat16),
            grid=grid,
            in_specs=[
                pl.BlockSpec((bt, K), lambda i: (i, 0)),
                pl.BlockSpec((K, OUT_PAD), lambda i: (0, 0)),
                pl.BlockSpec((1, OUT_PAD), lambda i: (0, 0)),
            ],
            out_specs=pl.BlockSpec((bt, OUT_PAD), lambda i: (i, 0)),
            compiler_params=pltpu.CompilerParams(
                dimension_semantics=("parallel",),
                vmem_limit_bytes=64 * 1024 * 1024,
            ),
            cost_estimate=_cost(B, K),
        )(x, w_p, b_p)

    if pad_output:
        return out_p  # (B, 128) bf16, columns 50..127 exactly zero
    return out_p[:, :OUT_FEATURES].astype(x.dtype)


if __name__ == "__main__":
    key = jax.random.PRNGKey(0)
    kx, kw, kb, kx2 = jax.random.split(key, 4)

    IN, OUT = IN_FEATURES, OUT_FEATURES
    # Deterministic synthetic parameters (PyTorch default Linear init is uniform;
    # here we just need deterministic values of the right shape), prepared ONCE.
    w = jax.random.normal(kw, (IN, OUT), dtype=jnp.float32) * 0.05
    b = jax.random.normal(kb, (OUT,), dtype=jnp.float32) * 0.05
    w_p, b_p = prepare_edge_params(w, b)

    # Reference numerics mirror the kernel: bf16-rounded x and W, f32 accumulate,
    # f32 bias + ReLU (kernel additionally rounds the output to bf16).
    w_ref = w.astype(jnp.bfloat16).astype(jnp.float32)

    def ref_fn(xv):
        x_r = xv.astype(jnp.bfloat16).astype(jnp.float32)
        return jnp.maximum(x_r @ w_ref + b, 0.0)

    # --- small batch: single-step (whole-array-in-VMEM) path ---
    B1 = 2
    x1 = jax.random.normal(kx, (B1, IN), dtype=jnp.float32)
    out1 = jax.block_until_ready(lenet_edge_side_forward(x1, w_p, b_p))
    assert out1.shape == (B1, OUT)
    assert jnp.allclose(out1, ref_fn(x1), atol=2e-2, rtol=2e-2)

    # --- gridded path (forced via small thresholds) with a ragged last block ---
    B2 = 24
    x2 = jax.random.normal(kx2, (B2, IN), dtype=jnp.float32)
    out2 = jax.block_until_ready(
        lenet_edge_side_forward(x2, w_p, b_p, batch_tile=16, single_step_rows=8)
    )
    assert out2.shape == (B2, OUT)
    assert jnp.allclose(out2, ref_fn(x2), atol=2e-2, rtol=2e-2)

    # --- padded-output path (for feeding fc2 without a slice/cast pass) ---
    out_pad = jax.block_until_ready(lenet_edge_side_forward(x1, w_p, b_p, pad_output=True))
    assert out_pad.shape == (B1, OUT_PAD) and out_pad.dtype == jnp.bfloat16
    assert jnp.all(out_pad[:, OUT:] == 0)

    print("KERNEL_OK")
</pallas_src>

<mosaic_0001>
module attributes {stable_mosaic.version = 11 : i64} {
  func.func @fc1_relu_kernel(%arg0: memref<2x320xf32, #tpu.memory_space<vmem>>, %arg1: memref<320x128xbf16, #tpu.memory_space<vmem>>, %arg2: memref<1x128xf32, #tpu.memory_space<vmem>>, %arg3: memref<2x128xbf16, #tpu.memory_space<vmem>>) attributes {dimension_semantics = [], scalar_prefetch = 0 : i64, scratch_operands = 0 : i64, tpu.core_type = #tpu.core_type<tc>} {
    %c0 = arith.constant 0 : index
    %c0_0 = arith.constant 0 : index
    %0 = vector.load %arg0[%c0, %c0_0] : memref<2x320xf32, #tpu.memory_space<vmem>>, vector<2x320xf32>
    %1 = arith.truncf %0 : vector<2x320xf32> to vector<2x320xbf16>
    %c0_1 = arith.constant 0 : index
    %c0_2 = arith.constant 0 : index
    %2 = vector.load %arg1[%c0_1, %c0_2] : memref<320x128xbf16, #tpu.memory_space<vmem>>, vector<320x128xbf16>
    %cst = arith.constant dense<0.000000e+00> : vector<2x128xf32>
    %3 = tpu.matmul %1, %2, %cst {dimension_numbers = #tpu.dot_dimension_numbers<[1], [0], [0], [1], [0, 0, 1, 1], [], []>} : vector<2x320xbf16>, vector<320x128xbf16>, vector<2x128xf32> -> vector<2x128xf32>
    %c0_3 = arith.constant 0 : index
    %c0_4 = arith.constant 0 : index
    %4 = vector.load %arg2[%c0_3, %c0_4] : memref<1x128xf32, #tpu.memory_space<vmem>>, vector<1x128xf32>
    %5 = vector.broadcast %4 : vector<1x128xf32> to vector<2x128xf32>
    %6 = arith.addf %3, %5 : vector<2x128xf32>
    %cst_5 = arith.constant 0.000000e+00 : f32
    %7 = vector.broadcast %cst_5 : f32 to vector<2x128xf32>
    %8 = arith.maximumf %6, %7 : vector<2x128xf32>
    %9 = arith.truncf %8 : vector<2x128xf32> to vector<2x128xbf16>
    %c0_6 = arith.constant 0 : index
    %c0_7 = arith.constant 0 : index
    %10 = vector.load %arg3[%c0_6, %c0_7] : memref<2x128xbf16, #tpu.memory_space<vmem>>, vector<2x128xbf16>
    tpu.vector_store %arg3[%c0_6, %c0_7], %9 {strides = array<i32>} : memref<2x128xbf16, #tpu.memory_space<vmem>>, vector<2x128xbf16>,
    return
  }
}

</mosaic_0001>

<bundles_post_ra>
// kernel: tpu_custom_call.1
= control target key start
LH: loop header
LB: loop body
LE: loop exit
PB: predicated region body
PF: predicated region fallthrough
CT: control target
= control target key end

     0   :  { %8 = vsyncpa [#allocation3], 0  ;;  %s572_s0 = inlined_call_operand.hbm [shape: f32[2,320], index: 0, kind: input, shape index: {}]   ;;  %s573_s1 = inlined_call_operand.hbm [shape: bf16[320,128], index: 1, kind: input, shape index: {}]   ;;  %s574_s2 = inlined_call_operand.vmem [shape: f32[1,128], index: 2, kind: input, shape index: {}]   ;;  %s575_s3 = inlined_call_operand.hbm [shape: bf16[2,128], index: 3, kind: output, shape index: {}]  }
   0x1   :  { %9 = vsyncpa [#allocation6], 0 }
   0x2   :  { %10 = vsyncpa [#allocation4], 0  ;;  %s498_s12 = smov [#allocation2]   ;;  %s499_s14 = smov [#allocation5]  }
   0x3   :  { %s17_s13 = sshll.u32 %s498_s12, 4  ;;  %s26_s15 = sshll.u32 %s499_s14, 4  ;;  %s18_s13 = int_to_ptr.vmem [resolvable:$true] %s17_s13  ;;  %s526_s15 = int_to_ptr.vmem [resolvable:$true] %s26_s15 }
   0x4   :  { %s426_s18 = scalar_lea.hbm %s572_s0, 96 }
   0x5   :  { %p427_p0 = scmp.ne.s32.totalorder %s572_s0, %s426_s18  ;;  %p430_p1 = scmp.lt.u32.totalorder %s426_s18, %s572_s0 }
   0x7   :  { %p432_p2 = pnand %p430_p1, %p427_p0 }
   0x9   :  { %435 = shalt.err (!%p432_p2)
}
   0xa   :  { %s436_s23 = scalar_lea.vmem %s18_s13, 96  ;;  %p441_p4 = scmp.lt.s32.totalorder %s18_s13, %s18_s13 }
   0xb   :  { %p437_p3 = scmp.ne.s32.totalorder %s18_s13, %s436_s23  ;;  %p442_p5 = scmp.lt.s32.totalorder %s436_s23, %s436_s23 }
   0xd   :  { %p443_p6 = por %p442_p5, %p441_p4 }
   0xf   :  { %p444_p7 = pnand %p443_p6, %p437_p3 }
  0x11   :  { %447 = shalt.err (!%p444_p7)
}
  0x12   :  { %20 = dma.hbm_to_vmem [thread:$0]  %s572_s0, 96, %s18_s13, [#allocation3]  }
  0x13   :  { %s448_s28 = scalar_lea.hbm %s573_s1, 2560 }
  0x14   :  { %p449_p8 = scmp.ne.s32.totalorder %s573_s1, %s448_s28  ;;  %p452_p9 = scmp.lt.u32.totalorder %s448_s28, %s573_s1 }
  0x16   :  { %p454_p10 = pnand %p452_p9, %p449_p8 }
  0x18   :  { %457 = shalt.err (!%p454_p10)
}
  0x19   :  { %s458_s6 = scalar_lea.vmem %s526_s15, 2560  ;;  %p463_p12 = scmp.lt.s32.totalorder %s526_s15, %s526_s15 }
  0x1a   :  { %p459_p11 = scmp.ne.s32.totalorder %s526_s15, %s458_s6  ;;  %p464_p13 = scmp.lt.s32.totalorder %s458_s6, %s458_s6 }
  0x1c   :  { %p465_p0 = por %p464_p13, %p463_p12 }
  0x1e   :  { %p466_p1 = pnand %p465_p0, %p459_p11 }
  0x20   :  { %469 = shalt.err (!%p466_p1)
}
  0x21   :  { %s500_s0 = smov 64   ;;  %s501_s7 = smov 4  }
  0x22   :  { %32 = dma.hbm_to_vmem [thread:$0]  %s573_s1, 2560, %s526_s15, [#allocation6], %s500_s0, %s500_s0, %s501_s7  }
  0x23   :  { %492 = dma.done.wait [#allocation3], 96  }
  0x24   :  { %493 = vsyncadd [#allocation3], 4294967200 }
  0x25   :  { %494 = dma.done.wait [#allocation6], 2560  }
  0x26   :  { %495 = vsyncadd [#allocation6], 4294964736  ;;  %v502_v0 = vmov 0.0   ;;  %vm503_vm0 = vmmov 0   ;;  %v405_v1 = vld [vmem:[#allocation5 + $0x40] sm:$0xff]   ;;  %v407_v3 = vld [vmem:[#allocation5 + $0x48] sm:$0xff]   ;;  %v48_v10 = vlaneseq }
  0x27   :  { %385 = vmatprep.subr.bf16.mxu1 %v502_v0  ;;  %393 = vmatprep.mubr.msk.bf16.mxu1 %vm503_vm0, %v502_v0  ;;  %v406_v2 = vld [vmem:[#allocation5] sm:$0xff]   ;;  %v408_v4 = vld [vmem:[#allocation5 + $0x8] sm:$0xff]   ;;  %v409_v5 = vld [vmem:[#allocation5 + $0x50] sm:$0xff]   ;;  %v504_v8 = vmov 1983009808   ;;  %vm233_vm1 = vcmask 523264  }
  0x28   :  { %358 = vmatprep.subr.bf16.mxu0 %v405_v1  ;;  %v410_v6 = vld [vmem:[#allocation5 + $0x10] sm:$0xff]   ;;  %v411_v7 = vld [vmem:[#allocation5 + $0x58] sm:$0xff]   ;;  %v46_v9 = vunpack.c.l.s4 %v504_v8  ;;  %v415_v11 = vld [vmem:[#allocation5 + $0x80] sm:$0xff]   ;;  %v49_v15 = vshrl.u32 %v48_v10, 7  ;;  %s505_s11 = smov [#allocation7]  }
  0x29   :  { %359 = vmatpush3.bf16.msra.mxu0 %v406_v2  ;;  %v412_v12 = vld [vmem:[#allocation5 + $0x18] sm:$0xff]   ;;  %v413_v13 = vld [vmem:[#allocation5 + $0x60] sm:$0xff]   ;;  %386 = vmatpush3.bf16.msra.mxu1 %v415_v11  ;;  %v418_v16 = vld [vmem:[#allocation5 + $0x88] sm:$0xff]   ;;  %s326_s12 = sshll.u32 %s505_s11, 4  ;;  %s327_s12 = int_to_ptr.vmem [resolvable:$true] %s326_s12 }
  0x2a   :  { %360 = vmatprep.subr.bf16.mxu0 %v407_v3  ;;  %v47_v14 = vunpack.c.0.s8 %v46_v9  ;;  %387 = vmatprep.subr.bf16.mxu1 %v502_v0  ;;  %v414_v17 = vld [vmem:[#allocation5 + $0x20] sm:$0xff]   ;;  %v416_v18 = vld [vmem:[#allocation5 + $0x68] sm:$0xff]   ;;  %v421_v19 = vld [vmem:[#allocation5 + $0x90] sm:$0xff]   ;;  %s470_s13 = scalar_lea.vmem %s327_s12, 16  ;;  %s474_s14 = scalar_lea.vmem %s327_s12, 32 }
  0x2b   :  { %v417_v21 = vld [vmem:[#allocation5 + $0x28] sm:$0xff]   ;;  %v42_v22 = vld [vmem:[#allocation2] sm:$0x3f]  ;;  %v419_v23 = vld [vmem:[#allocation5 + $0x70] sm:$0xff]   ;;  %p471_p2 = scmp.ne.s32.totalorder %s327_s12, %s470_s13  ;;  %p475_p3 = scmp.lt.s32.totalorder %s327_s12, %s327_s12 }
  0x2c   :  { %v50_v20 = vsub.s32 %v47_v14, %v49_v15  ;;  %v44_v24 = vcombine.high %v42_v22, %v42_v22  ;;  %v425_v26 = vld [vmem:[#allocation5 + $0x98] sm:$0xff]   ;;  %v420_v29 = vld [vmem:[#allocation5 + $0x30] sm:$0xff]   ;;  %p476_p4 = scmp.lt.s32.totalorder %s474_s14, %s470_s13 }
  0x2d   :  { %361 = vmatpush3.bf16.msra.mxu0 %v408_v4  ;;  %388 = vmatpush3.bf16.msra.mxu1 %v418_v16  ;;  %v422_v30 = vld [vmem:[#allocation5 + $0x78] sm:$0xff]  }
  0x2e   :  { %362 = vmatprep.subr.bf16.mxu0 %v409_v5  ;;  %389 = vmatprep.subr.bf16.mxu1 %v502_v0  ;;  %v51_v25 = vrot.slane %v42_v22, %v50_v20  ;;  %v58_v27 = vrot.slane %v44_v24, %v50_v20  ;;  %v423_v33 = vld [vmem:[#allocation5 + $0x38] sm:$0xff]   ;;  %p477_p5 = por %p476_p4, %p475_p3 }
  0x2f   :  { %v336_v41 = vld [vmem:[%s574_s2] ss:$0 sm:$0xff] }
  0x30   :  { %v59_v28 = vcombine.high %v51_v25, %v51_v25  ;;  %v65_v32 = vpack.c.bf16 %v58_v27, %v58_v27  ;;  %v63_v34 = vpack.c.bf16 %v51_v25, %v51_v25  ;;  %p478_p6 = pnand %p477_p5, %p471_p2 }
  0x31   :  { %363 = vmatpush3.bf16.msra.mxu0 %v410_v6  ;;  %390 = vmatpush3.bf16.msra.mxu1 %v421_v19 }
  0x32   :  { %364 = vmatprep.subr.bf16.mxu0 %v411_v7  ;;  %391 = vmatprep.subr.bf16.mxu1 %v502_v0  ;;  %v64_v31 = vpack.c.bf16 %v59_v28, %v59_v28 }
  0x34   :  { %269 = vmatprep.mubr.bf16.mxu0 %v64_v31 }
  0x35   :  { %365 = vmatpush3.bf16.msra.mxu0 %v412_v12  ;;  %392 = vmatpush3.bf16.msra.mxu1 %v425_v26 }
  0x36   :  { %366 = vmatprep.subr.bf16.mxu0 %v413_v13 }
  0x38   :  { %394 = vmatmul.mubr.msk.bf16.vlgmr.msra.gmra.mrb[0].mxu1 %vm233_vm1, %v65_v32 }
  0x39   :  { %367 = vmatpush3.bf16.msra.mxu0 %v414_v17 }
  0x3a   :  { %368 = vmatprep.subr.bf16.mxu0 %v416_v18 }
  0x3d   :  { %369 = vmatpush3.bf16.msra.mxu0 %v417_v21 }
  0x3e   :  { %370 = vmatprep.subr.bf16.mxu0 %v419_v23 }
  0x41   :  { %371 = vmatpush3.bf16.msra.mxu0 %v420_v29 }
  0x42   :  { %372 = vmatprep.subr.bf16.mxu0 %v422_v30 }
  0x45   :  { %373 = vmatpush3.bf16.msra.mxu0 %v423_v33 }
  0x48   :  { %270 = vmatmul.mubr.bf16.vlgmr.msra.gmra.mrb[0].mxu0 %v63_v34 }
 0x10b   :  { %v311_v35 = vpop.f32.mrb[0].mxu1 }
 0x10c   :  { %v395_v36 = vpop.f32.mrb[1].mxu1 }
 0x10d   :  { %v314_v37 = vpop.f32.mrb[2].mxu1 }
 0x10e   :  { %v396_v38 = vpop.f32.mrb[3].mxu1 }
 0x11b   :  { %v374_v39 = vpop.f32.mrb[0].mxu0 }
 0x11c   :  { %v375_v40 = vpop.f32.mrb[1].mxu0 }
 0x11d   :  { %v376_v42 = vadd.f32 %v375_v40, %v374_v39  ;;  %v377_v43 = vpop.f32.mrb[2].mxu0 }
 0x11e   :  { %v378_v44 = vpop.f32.mrb[3].mxu0 }
 0x11f   :  { %v272_v45 = vadd.f32 %v376_v42, %v336_v41 }
 0x121   :  { %v312_v46 = vadd.f32 %v311_v35, %v272_v45 }
 0x123   :  { %v317_v47 = vmax.f32 %v312_v46, 0.0 }
 0x125   :  { %v318_v48 = vpack.c.bf16 %v317_v47, %v317_v47 }
 0x127   :  { %319 = vst [vmem:[#allocation7] sm:$0x1] %v318_v48 }
 0x128   :  { %481 = shalt.err (!%p478_p6)
}
 0x129   :  { %s482_s16 = scalar_lea.hbm %s575_s3, 16 }
 0x12a   :  { %p483_p7 = scmp.ne.s32.totalorder %s575_s3, %s482_s16  ;;  %p486_p8 = scmp.lt.u32.totalorder %s482_s16, %s575_s3 }
 0x12c   :  { %p488_p9 = pnand %p486_p8, %p483_p7 }
 0x12e   :  { %491 = shalt.err (!%p488_p9)
}
 0x12f   :  { %329 = dma.vmem_to_hbm [thread:$0]  %s327_s12, 16, %s575_s3, [#allocation4]  }
 0x130   :  { %496 = dma.done.wait [#allocation4], 16  }
 0x131   :  { %497 = vsyncadd [#allocation4], 4294967280 }
 0x132   :  { %333 = vsyncpa [#allocation3], 1 }
 0x133   :  { %334 = vsyncpa [#allocation6], 1 }
 0x134   :  { %335 = vsyncpa [#allocation4], 1 }

</bundles_post_ra>
